<compile_context>
chip_gen: v6e
topology: v6e:2x2x1
jax: 0.10.0
libtpu: 0.0.40
codegen_flags: <defaults>
</compile_context>

<pallas_src>
import functools
import math

import jax
import jax.numpy as jnp
from jax.experimental import pallas as pl
from jax.experimental.pallas import tpu as pltpu

_LANE = 128


def _round_up(x, m):
    return ((x + m - 1) // m) * m


def _cdiv(a, b):
    return (a + b - 1) // b


# ---------------------------------------------------------------------------
# Deterministic "parameter" construction (no checkpoints): Hann window,
# real-DFT basis matrices, and the HTK mel filterbank -- exactly what
# torchaudio.transforms.MelSpectrogram builds in __init__.
# ---------------------------------------------------------------------------
def _hann_window(win_length):
    # torch.hann_window(win_length, periodic=True)
    n = jnp.arange(win_length, dtype=jnp.float32)
    return 0.5 * (1.0 - jnp.cos(2.0 * math.pi * n / win_length))


def _dft_matrices(n_fft, win_length):
    # Window folded into the DFT basis: frames @ cos -> Re, frames @ sin -> -Im.
    window = _hann_window(win_length)
    pad_l = (n_fft - win_length) // 2
    window = jnp.pad(window, (pad_l, n_fft - win_length - pad_l))
    n = jnp.arange(n_fft, dtype=jnp.float32)
    k = jnp.arange(n_fft // 2 + 1, dtype=jnp.float32)
    ang = 2.0 * math.pi * n[:, None] * k[None, :] / n_fft
    cos_m = jnp.cos(ang) * window[:, None]
    sin_m = jnp.sin(ang) * window[:, None]
    return cos_m.astype(jnp.float32), sin_m.astype(jnp.float32)


def _mel_filterbank(n_freqs, f_min, f_max, n_mels, sample_rate):
    # torchaudio.functional.melscale_fbanks, mel_scale="htk", norm=None
    def hz_to_mel(f):
        return 2595.0 * jnp.log10(1.0 + f / 700.0)

    def mel_to_hz(m):
        return 700.0 * (10.0 ** (m / 2595.0) - 1.0)

    all_freqs = jnp.linspace(0.0, sample_rate / 2.0, n_freqs)
    m_min = hz_to_mel(jnp.asarray(f_min, jnp.float32))
    m_max = hz_to_mel(jnp.asarray(f_max, jnp.float32))
    m_pts = jnp.linspace(m_min, m_max, n_mels + 2)
    f_pts = mel_to_hz(m_pts)
    f_diff = f_pts[1:] - f_pts[:-1]                    # (n_mels + 1,)
    slopes = f_pts[None, :] - all_freqs[:, None]       # (n_freqs, n_mels + 2)
    down = -slopes[:, :-2] / f_diff[:-1]
    up = slopes[:, 2:] / f_diff[1:]
    fb = jnp.maximum(0.0, jnp.minimum(down, up))
    return fb.astype(jnp.float32)                      # (n_freqs, n_mels)


# ---------------------------------------------------------------------------
# Pallas kernel: in-kernel framing (split-K over overlapping hop-row windows)
# + packed bf16 DFT matmul + power + bf16 mel matmul + 10*log10, transposed
# lane-dense store.
# ---------------------------------------------------------------------------
def _logmel_kernel(x_ref, basis_ref, fb2_ref, out_ref, *,
                   tt, hop, n_fft, n_chunks, w_rows):
    i = pl.program_id(1)
    row0 = pl.multiple_of(i * tt, 8)
    # Aligned dynamic-start load of the hop-row window that covers all tt
    # frames of this tile (frame t uses rows t .. t + n_chunks - 1).
    win = x_ref[pl.ds(row0, w_rows), :]                # (w_rows, hop) f32

    # Split-K DFT: y[t, :] = sum_j frames[t, j*hop : j*hop+kj] @ basis_chunk_j,
    # where the frame chunk is just row (t + j) of the window -> static slices.
    y = None
    for j in range(n_chunks):
        k0 = j * hop
        kj = min(hop, n_fft - k0)
        lhs = jax.lax.slice(win, (j, 0), (j + tt, kj)).astype(jnp.bfloat16)
        rhs = basis_ref[k0:k0 + kj, :]                 # (kj, n_fft_p) bf16
        contrib = jnp.dot(lhs, rhs, preferred_element_type=jnp.float32)
        y = contrib if y is None else y + contrib      # (tt, n_fft_p) f32

    # Packed power terms (re^2 columns then im^2 columns); fb2's duplicated
    # rows perform the re^2 + im^2 reduction inside the mel matmul.
    p = (y * y).astype(jnp.bfloat16)
    mel = jnp.dot(p, fb2_ref[...],
                  preferred_element_type=jnp.float32)  # (tt, nm_pad)
    mel = jnp.maximum(mel, 1e-10)                      # AmplitudeToDB amin clamp
    db = 10.0 * jnp.log10(mel)                         # power -> dB (db_multiplier == 0)
    out_ref[0] = db.T                                  # transposed store (nm_pad, tt)


def log_mel_base(x, *, sample_rate, n_mels, n_fft, win_length, hop_length,
                 f_min, top_db=80.0, tm=512):
    """x: (B, N) float32 waveform  ->  (B, n_mels, T) log-mel in dB."""
    B, N = x.shape
    hop = hop_length
    n_freq = n_fft // 2 + 1
    pad = n_fft // 2
    T = 1 + N // hop

    # ---- time tile (frames per grid step) ----
    if T <= 256:
        tt = _round_up(T, 8)                           # tiny inputs: no over-padding
    else:
        tt = min(_round_up(tm, 256), _round_up(T, 256))  # 256-multiples for the MXU
        if B == 1:
            # keep >=2 time tiles so the grid can split across v7x's two TCs
            tt = max(256, min(tt, _round_up(_cdiv(T, 2), 256)))
    nt = _cdiv(T, tt)
    T_pad = nt * tt

    n_chunks = _cdiv(n_fft, hop)                       # rows of overlap per frame
    w_rows = _round_up(tt + n_chunks - 1, 8)           # window rows per tile
    n_rows = (nt - 1) * tt + w_rows                    # hop-rows per batch (mult of 8)

    # ---- framing source: padded waveform viewed as rows of `hop` samples ----
    # center=True, pad_mode="reflect" (torch.stft) done in glue; the rest of
    # the framing happens inside the kernel from this row view.
    x_pad = jnp.pad(x.astype(jnp.float32), ((0, 0), (pad, pad)), mode="reflect")
    L0 = N + 2 * pad
    L_need = n_rows * hop
    if L_need >= L0:
        x_lin = jnp.pad(x_pad, ((0, 0), (0, L_need - L0)))
    else:
        x_lin = x_pad[:, :L_need]                      # tail no valid frame reads
    x_rows = x_lin.reshape(B * n_rows, hop)            # (B*n_rows, hop) f32

    # ---- packed real-DFT basis: exactly n_fft useful columns ----
    n_fft_p = _round_up(n_fft, _LANE)
    nm_pad = _round_up(n_mels, _LANE)
    cos_m, sin_m = _dft_matrices(n_fft, win_length)    # (n_fft, n_freq)
    # sin bin 0 (and bin n_fft/2 for even n_fft) are identically zero -> drop.
    sin_hi = n_freq - 1 if n_fft % 2 == 0 else n_freq
    sin_keep = jnp.arange(1, sin_hi)
    basis = jnp.concatenate([cos_m, sin_m[:, sin_keep]], axis=1)   # (n_fft, n_fft)
    basis = jnp.pad(basis, ((0, 0), (0, n_fft_p - n_fft))).astype(jnp.bfloat16)

    # Stacked mel filterbank: row k for cos^2 terms, duplicated rows for sin^2,
    # so (y*y) @ fb2 == (re^2 + im^2) @ fb exactly.
    fb = _mel_filterbank(n_freq, f_min, sample_rate / 2.0, n_mels, sample_rate)
    fb2 = jnp.concatenate([fb, fb[sin_keep, :]], axis=0)           # (n_fft, n_mels)
    fb2 = jnp.pad(fb2, ((0, n_fft_p - n_fft), (0, nm_pad - n_mels))
                  ).astype(jnp.bfloat16)                           # (n_fft_p, nm_pad)

    kernel = functools.partial(_logmel_kernel, tt=tt, hop=hop, n_fft=n_fft,
                               n_chunks=n_chunks, w_rows=w_rows)

    out = pl.pallas_call(
        kernel,
        out_shape=jax.ShapeDtypeStruct((B, nm_pad, T_pad), jnp.float32),
        grid_spec=pltpu.PrefetchScalarGridSpec(
            num_scalar_prefetch=0,
            grid=(B, nt),
            in_specs=[
                # waveform rows: resident per batch (re-DMAed only when b changes)
                pl.BlockSpec((n_rows, hop), lambda b, i: (b, 0)),
                # packed cos|sin basis: grid-resident
                pl.BlockSpec((n_fft, n_fft_p), lambda b, i: (0, 0)),
                # stacked mel filterbank: grid-resident
                pl.BlockSpec((n_fft_p, nm_pad), lambda b, i: (0, 0)),
            ],
            # transposed output block -> final (B, F, T) layout directly
            out_specs=pl.BlockSpec((1, nm_pad, tt), lambda b, i: (b, 0, i)),
        ),
        compiler_params=pltpu.CompilerParams(
            dimension_semantics=("parallel", "parallel"),
            # Budget at realistic shapes is ~10-16 MiB; 32 MiB is safe on
            # v5e/v6e/v7x.  Can be raised on v5e/v6e for very large n_fft/T.
            vmem_limit_bytes=32 * 1024 * 1024,
        ),
    )(x_rows, basis, fb2)                              # (B, nm_pad, T_pad)

    # Drop padded mel rows / padded time columns BEFORE the top_db max so the
    # junk tail frames never participate in the clamp reference.
    db = out[:, :n_mels, :T]                           # (B, n_mels, T)
    # AmplitudeToDB top_db clamp: global max over the whole (B, F, T) tensor
    # (matches torchaudio's 3-D-input behavior).  Cross-grid reduction -> glue.
    db = jnp.maximum(db, jnp.max(db) - top_db)
    return db


if __name__ == "__main__":
    key = jax.random.PRNGKey(0)
    B, N = 2, 512
    sample_rate, n_mels, n_fft = 16000, 64, 128
    win_length, hop_length, f_min = 128, 64, 0.0

    x = jax.random.normal(key, (B, N), dtype=jnp.float32)

    out = log_mel_base(
        x,
        sample_rate=sample_rate, n_mels=n_mels, n_fft=n_fft,
        win_length=win_length, hop_length=hop_length, f_min=f_min,
    )
    out = jax.block_until_ready(out)

    T = 1 + N // hop_length
    assert out.shape == (B, n_mels, T), out.shape
    assert out.dtype == jnp.float32
    assert bool(jnp.all(jnp.isfinite(out)))
    print("KERNEL_OK")
</pallas_src>

<mosaic_0001>
module attributes {stable_mosaic.version = 11 : i64} {
  func.func @_logmel_kernel(%arg0: i32, %arg1: i32, %arg2: memref<24x64xf32, #tpu.memory_space<vmem>>, %arg3: memref<128x128xbf16, #tpu.memory_space<vmem>>, %arg4: memref<128x128xbf16, #tpu.memory_space<vmem>>, %arg5: memref<1x128x16xf32, #tpu.memory_space<vmem>>) attributes {dimension_semantics = [#tpu.dimension_semantics<parallel>, #tpu.dimension_semantics<parallel>], iteration_bounds = array<i64: 2, 1>, scalar_prefetch = 0 : i64, scratch_operands = 0 : i64, tpu.core_type = #tpu.core_type<tc>, window_params = [{transform_indices = @transform_0, window_bounds = array<i64: 24, 64>}, {pipeline_mode = #tpu.pipeline_mode<synchronous>, transform_indices = @transform_1, window_bounds = array<i64: 128, 128>}, {pipeline_mode = #tpu.pipeline_mode<synchronous>, transform_indices = @transform_2, window_bounds = array<i64: 128, 128>}, {transform_indices = @transform_3, window_bounds = array<i64: 1, 128, 16>}]} {
    %c16_i32 = arith.constant 16 : i32
    %0 = arith.muli %arg1, %c16_i32 : i32
    %1 = tpu.assume_multiple %0, 8 : i32
    %2 = arith.index_cast %1 : i32 to index
    %c0 = arith.constant 0 : index
    %3 = vector.load %arg2[%2, %c0] : memref<24x64xf32, #tpu.memory_space<vmem>>, vector<24x64xf32>
    %4 = vector.extract_strided_slice %3 {offsets = [0, 0], sizes = [16, 64], strides = [1, 1]} : vector<24x64xf32> to vector<16x64xf32>
    %5 = arith.truncf %4 : vector<16x64xf32> to vector<16x64xbf16>
    %c0_0 = arith.constant 0 : index
    %c0_1 = arith.constant 0 : index
    %6 = vector.load %arg3[%c0_0, %c0_1] : memref<128x128xbf16, #tpu.memory_space<vmem>>, vector<64x128xbf16>
    %cst = arith.constant dense<0.000000e+00> : vector<16x128xf32>
    %7 = tpu.matmul %5, %6, %cst {dimension_numbers = #tpu.dot_dimension_numbers<[1], [0], [0], [1], [0, 0, 1, 1], [], []>} : vector<16x64xbf16>, vector<64x128xbf16>, vector<16x128xf32> -> vector<16x128xf32>
    %8 = vector.extract_strided_slice %3 {offsets = [1, 0], sizes = [16, 64], strides = [1, 1]} : vector<24x64xf32> to vector<16x64xf32>
    %9 = arith.truncf %8 : vector<16x64xf32> to vector<16x64xbf16>
    %c64 = arith.constant 64 : index
    %c0_2 = arith.constant 0 : index
    %10 = vector.load %arg3[%c64, %c0_2] : memref<128x128xbf16, #tpu.memory_space<vmem>>, vector<64x128xbf16>
    %cst_3 = arith.constant dense<0.000000e+00> : vector<16x128xf32>
    %11 = tpu.matmul %9, %10, %cst_3 {dimension_numbers = #tpu.dot_dimension_numbers<[1], [0], [0], [1], [0, 0, 1, 1], [], []>} : vector<16x64xbf16>, vector<64x128xbf16>, vector<16x128xf32> -> vector<16x128xf32>
    %12 = arith.addf %7, %11 : vector<16x128xf32>
    %13 = arith.mulf %12, %12 : vector<16x128xf32>
    %14 = arith.truncf %13 : vector<16x128xf32> to vector<16x128xbf16>
    %c0_4 = arith.constant 0 : index
    %c0_5 = arith.constant 0 : index
    %15 = vector.load %arg4[%c0_4, %c0_5] : memref<128x128xbf16, #tpu.memory_space<vmem>>, vector<128x128xbf16>
    %cst_6 = arith.constant dense<0.000000e+00> : vector<16x128xf32>
    %16 = tpu.matmul %14, %15, %cst_6 {dimension_numbers = #tpu.dot_dimension_numbers<[1], [0], [0], [1], [0, 0, 1, 1], [], []>} : vector<16x128xbf16>, vector<128x128xbf16>, vector<16x128xf32> -> vector<16x128xf32>
    %cst_7 = arith.constant 1.000000e-10 : f32
    %17 = vector.broadcast %cst_7 : f32 to vector<16x128xf32>
    %18 = arith.maximumf %16, %17 : vector<16x128xf32>
    %19 = math.log %18 : vector<16x128xf32>
    %cst_8 = arith.constant 0.434294492 : f32
    %20 = vector.broadcast %cst_8 : f32 to vector<16x128xf32>
    %21 = arith.mulf %19, %20 : vector<16x128xf32>
    %cst_9 = arith.constant 1.000000e+01 : f32
    %22 = vector.broadcast %cst_9 : f32 to vector<16x128xf32>
    %23 = arith.mulf %22, %21 : vector<16x128xf32>
    %24 = tpu.transpose %23, [1, 0] : vector<16x128xf32> -> vector<128x16xf32>
    %c0_10 = arith.constant 0 : index
    %c0_11 = arith.constant 0 : index
    %c0_12 = arith.constant 0 : index
    %25 = vector.load %arg5[%c0_10, %c0_11, %c0_12] : memref<1x128x16xf32, #tpu.memory_space<vmem>>, vector<1x128x16xf32>
    %26 = vector.shape_cast %25 : vector<1x128x16xf32> to vector<128x16xf32>
    %27 = vector.shape_cast %24 : vector<128x16xf32> to vector<1x128x16xf32>
    tpu.vector_store %arg5[%c0_10, %c0_11, %c0_12], %27 {strides = array<i32>} : memref<1x128x16xf32, #tpu.memory_space<vmem>>, vector<1x128x16xf32>,
    return
  }
  func.func @transform_0(%arg0: i32, %arg1: i32) -> (i32, i32) {
    %c0_i32 = arith.constant 0 : i32
    %c0_i32_0 = arith.constant 0 : i32
    return %arg0, %c0_i32 : i32, i32
  }
  func.func @transform_1(%arg0: i32, %arg1: i32) -> (i32, i32) {
    %c0_i32 = arith.constant 0 : i32
    %c0_i32_0 = arith.constant 0 : i32
    %c0_i32_1 = arith.constant 0 : i32
    return %c0_i32, %c0_i32_0 : i32, i32
  }
  func.func @transform_2(%arg0: i32, %arg1: i32) -> (i32, i32) {
    %c0_i32 = arith.constant 0 : i32
    %c0_i32_0 = arith.constant 0 : i32
    %c0_i32_1 = arith.constant 0 : i32
    return %c0_i32, %c0_i32_0 : i32, i32
  }
  func.func @transform_3(%arg0: i32, %arg1: i32) -> (i32, i32, i32) {
    %c0_i32 = arith.constant 0 : i32
    %c0_i32_0 = arith.constant 0 : i32
    return %arg0, %c0_i32, %arg1 : i32, i32, i32
  }
}

</mosaic_0001>

<bundles_post_ra>
// kernel: tpu_custom_call.1
= control target key start
LH: loop header
LB: loop body
LE: loop exit
PB: predicated region body
PF: predicated region fallthrough
CT: control target
= control target key end

     0   :  { %8 = vsyncpa [#allocation3], 0  ;;  %s1248_s0 = inlined_call_operand.hbm [shape: f32[48,64], index: 0, kind: input, shape index: {}]   ;;  %s1249_s1 = inlined_call_operand.hbm [shape: bf16[128,128], index: 1, kind: input, shape index: {}]   ;;  %s1250_s2 = inlined_call_operand.hbm [shape: bf16[128,128], index: 2, kind: input, shape index: {}]   ;;  %s1251_s3 = inlined_call_operand.vmem [shape: f32[2,128,16], index: 3, kind: output, shape index: {}]  }
   0x1   :  { %10 = vsyncpa [#allocation3 + $0x1], 0 }
   0x2   :  { %11 = vsyncpa [#allocation5], 0  ;;  %s1057_s12 = smov 0   ;;  %s1059_s13 = smov 0  }
   0x3   :  { %s1061_s14 = smov 0   ;;  %s1063_s15 = smov 0  }
   0x4   :  { %s1065_s16 = smov 0   ;;  %s1067_s17 = smov 0  }
   0x5 LB: > { %s691_s18 = sadd.s32 4294967295, %s1026_s17   ;;  %p49_p0 = scmp.ne.s32.totalorder %s1010_s13, %s1006_s12  ;;  %s1026_s17 = sphi %s1067_s17, %s17_s17   ;;  %s1022_s16 = sphi %s1065_s16, %s1264_s16   ;;  %s1018_s15 = sphi %s1063_s15, %s1263_s15   ;;  %s1014_s14 = sphi %s1061_s14, %s1262_s14   ;;  %s1010_s13 = sphi %s1059_s13, %s1261_s13   ;;  %s1006_s12 = sphi %s1057_s12, %s1260_s12  }
   0x6   : > { %p1087_p1 = scmp.eq.s32.totalorder %s691_s18, 0  ;;  %p693_p2 = scmp.ge.s32.totalorder %s1026_s17, 1 }
   0x7   : > { %p130_p3 = scmp.lt.s32.totalorder %s1026_s17, 3  ;;  %s1028_s22 = smov [#allocation4]  }
   0x8   : > { %s1254_s19 = scalar_select %p1087_p1, 1, 0 }
   0x9   : > { %p1095_p4 = por %p1087_p1, %p49_p0  ;;  %p1099_p5 = pnand %p693_p2, %p130_p3 }
   0xa   : > { %s142_s23 = sshll.u32 %s1028_s22, 4  ;;  %s1029_s25 = smov [#allocation6]   ;;  %s143_s23 = int_to_ptr.vmem [resolvable:$true] %s142_s23 }
   0xb   : > { %p800_p6 = pneg %p1099_p5  ;;  %s155_s26 = sshll.u32 %s1029_s25, 4  ;;  %s156_s26 = int_to_ptr.vmem [resolvable:$true] %s155_s26 }
   0xc   : > { %s903_s27 = scalar_lea.vmem %s143_s23, 1024  ;;  %p911_p12 = scmp.lt.s32.totalorder %s143_s23, %s143_s23 }
   0xd   : > { %p1107_p7 = pnand %p800_p6, %p1087_p1  ;;  %p904_p9 = scmp.ne.s32.totalorder %s143_s23, %s903_s27 }
   0xe   : > { %p912_p13 = scmp.lt.s32.totalorder %s903_s27, %s903_s27 }
   0xf   : > { %p894_p8 = pneg %p1107_p7 }
  0x10   : > { %p913_p0 = por %p912_p13, %p911_p12 }
  0x11   : > { %p906_p10 = pnand %p904_p9, %p894_p8 }
  0x13   : > { %p907_p11 = pneg %p906_p10 }
  0x15   : > { %p914_p2 = pnand %p913_p0, %p907_p11 }
  0x17   : > { %917 = shalt.err (!%p914_p2)
}
  0x18   : > { %s1030_s28 = smov 64   ;;  %s1031_s29 = smov 4  }
  0x19   : > { %803 = dma.hbm_to_vmem [thread:$0]  (!%p1107_p7), %s1249_s1, 1024, %s143_s23, [#allocation5], %s1030_s28, %s1030_s28, %s1031_s29  }
  0x1a   : > { %s929_s5 = scalar_lea.vmem %s156_s26, 1024  ;;  %p937_p10 = scmp.lt.s32.totalorder %s156_s26, %s156_s26 }
  0x1b   : > { %p930_p3 = scmp.ne.s32.totalorder %s156_s26, %s929_s5  ;;  %p938_p1 = scmp.lt.s32.totalorder %s929_s5, %s929_s5 }
  0x1d   : > { %p932_p6 = pnand %p930_p3, %p894_p8  ;;  %p939_p12 = por %p938_p1, %p937_p10 }
  0x1f   : > { %p933_p9 = pneg %p932_p6 }
  0x21   : > { %p940_p11 = pnand %p939_p12, %p933_p9 }
  0x23   : > { %943 = shalt.err (!%p940_p11)
}
  0x24   : > { %806 = dma.hbm_to_vmem [thread:$0]  (!%p1107_p7), %s1250_s2, 1024, %s156_s26, [#allocation5], %s1030_s28, %s1030_s28, %s1031_s29  }
  0x25   : > { %s29_s8 = sadd.s32 1, %s1022_s16  ;;  %s36_s9 = sadd.s32 1, %s1014_s14 }
  0x26   : > { %p31_p1 = scmp.ge.s32.totalorder %s29_s8, 2  ;;  %p43_p8 = scmp.ne.s32.totalorder %s1014_s14, %s1010_s13 }
  0x27   : > { %p44_p13 = scmp.eq.s32.totalorder %s1026_s17, 0  ;;  %p813_p0 = scmp.lt.s32.totalorder %s1026_s17, 2 }
  0x28   : > { %s1266_s8 = smov (%p31_p1, %s29_s8), 0  ;;  %s169_s10 = sand.u32 1, %s1014_s14  }
  0x29   : > { %p45_p2 = por %p44_p13, %p43_p8  ;;  %s33_s11 = ssub.s32 %s1022_s16, %s1266_s8 }
  0x2a   : > { %p34_p3 = scmp.eq.s32.totalorder %s33_s11, 0  ;;  %s788_s12 = smul.u32 24, %s169_s10 }
  0x2b   : > { %s723_s18 = smul.u32 384, %s1022_s16  ;;  %p1141_p6 = pnand %p813_p0, %p45_p2 }
  0x2c   : > { %s1146_s23 = scalar_select %p34_p3, %s1014_s14, %s36_s9  }
  0x2d   : > { %s179_s26 = scalar_lea.hbm %s1248_s0, %s723_s18  ;;  %s173_s27 = scalar_lea.vmem [#allocation2], %s788_s12 }
  0x2e   : > { %s180_s28 = sshll.u32 %s173_s27, 4  ;;  %s170_s29 = scalar_lea.sflag [#allocation3], %s169_s10  ;;  %s181_s28 = int_to_ptr.vmem [resolvable:$true] %s180_s28 }
  0x2f   : > { %p946_p7 = pneg %p1141_p6  ;;  %s957_s30 = scalar_lea.vmem %s181_s28, 384 }
  0x30   : > { %p958_p9 = scmp.ne.s32.totalorder %s181_s28, %s957_s30  ;;  %s1032_s4 = smov [#allocation2]  }
  0x31   : > { %s962_s5 = sshll.u32 %s1032_s4, 4  ;;  %s963_s5 = int_to_ptr.vmem [resolvable:$false] %s962_s5 }
  0x32   : > { %p960_p10 = pnand %p958_p9, %p946_p7  ;;  %s964_s6 = scalar_lea.vmem %s963_s5, 768 }
  0x33   : > { %p965_p11 = scmp.lt.s32.totalorder %s181_s28, %s963_s5  ;;  %p966_p1 = scmp.lt.s32.totalorder %s964_s6, %s957_s30 }
  0x34   : > { %p961_p12 = pneg %p960_p10 }
  0x35   : > { %p967_p8 = por %p966_p1, %p965_p11 }
  0x37   : > { %p968_p13 = pnand %p967_p8, %p961_p12 }
  0x39   : > { %971 = shalt.err (!%p968_p13)
}
  0x3a   : > { %s1033_s7 = smov 128   ;;  %s1034_s9 = smov 8  }
  0x3b   : > { %810 = dma.hbm_to_vmem [thread:$0]  (!%p1141_p6), %s179_s26, 384, %s181_s28, %s170_s29, %s1033_s7, %s1033_s7, %s1034_s9  }
  0x3c   : > { %192 = sbr.rel (%p1099_p5) target bundleno = 707 (0x2c3), region = 32  ;;  %s194_s10 = sand.u32 (!%p1099_p5), 1, %s1010_s13  }
  0x3d   : > { %s789_s11 = smul.u32 (!%p1099_p5), 24, %s194_s10  ;;  %s195_s12 = scalar_lea.sflag (!%p1099_p5), [#allocation3], %s194_s10 }
  0x3f   : > { %s198_s18 = scalar_lea.vmem (!%p1099_p5), [#allocation2], %s789_s11 }
  0x41   : > { %997 = dma.done.wait (%p1095_p4), %s195_s12, 384  }
  0x42   : > { %999 = vsyncadd (%p1095_p4), %s195_s12, 4294966912  ;;  %p1259_p0 = scmp.ne.s32.totalorder %s1254_s19, 0 }
  0x44   : > { %1001 = dma.done.wait (%p1259_p0), [#allocation5], 2048  }
  0x45   : > { %1003 = vsyncadd (%p1259_p0), [#allocation5], 4294965248  ;;  %v1035_v0 = vmov 0.0   ;;  %vm1036_vm0 = vmmov 0   ;;  %v872_v1 = vld [vmem:[#allocation4 + $0x38] sm:$0xff]   ;;  %v873_v2 = vld [vmem:[#allocation4 + $0x30] sm:$0xff]  }
  0x46   : > { %744 = vmatprep.subr.bf16.mxu1 %v1035_v0  ;;  %752 = vmatprep.mubr.msk.bf16.mxu1 %vm1036_vm0, %v1035_v0  ;;  %v244_v3 = vld [vmem:[%s198_s18] sm:$0xff]  ;;  %v245_v4 = vld [vmem:[%s198_s18 + $0x8] sm:$0xff]  ;;  %v246_v5 = vld [vmem:[%s198_s18 + $0x10] sm:$0xff]  ;;  %vm265_vm1 = vsmask.f32 7424  ;;  %vm302_vm2 = vcmask 523264  }
  0x47   : > { %768 = vmatprep.subr.bf16.mxu0 %v1035_v0  ;;  %784 = vmatprep.mubr.msk.bf16.mxu0 %vm1036_vm0, %v1035_v0  ;;  %v247_v6 = vpack.c.bf16 %v245_v4, %v244_v3  ;;  %v256_v7 = vpack.c.bf16 %v246_v5, %v246_v5  ;;  %v874_v8 = vld [vmem:[#allocation4 + $0x28] sm:$0xff]   ;;  %v875_v12 = vld [vmem:[#allocation4 + $0x20] sm:$0xff]   ;;  %v880_v15 = vld [vmem:[#allocation6 + $0x38] sm:$0xff]   ;;  %p233_p4 = scmp.lt.s32.totalorder %s1018_s15, 1  ;;  %vm564_vm3 = vcmask 130048  }
  0x48   : > { %745 = vmatpush3.bf16.msra.mxu1 %v872_v1  ;;  %769 = vmatpush3.bf16.msra.mxu0 %v880_v15  ;;  %v876_v17 = vld [vmem:[#allocation4 + $0x18] sm:$0xff]   ;;  %v877_v19 = vld [vmem:[#allocation4 + $0x10] sm:$0xff]   ;;  %v878_v20 = vld [vmem:[#allocation4 + $0x8] sm:$0xff]  }
  0x49   : > { %746 = vmatprep.subr.bf16.mxu1 %v1035_v0  ;;  %v267_v9 = vshrl.u32 %v247_v6, 16  ;;  %v269_v10 = vshll.u32 %v247_v6, 16  ;;  %v274_v11 = vshll.u32 %v256_v7, 16  ;;  %770 = vmatprep.subr.bf16.mxu0 %v1035_v0  ;;  %v879_v21 = vld [vmem:[#allocation4] sm:$0xff]   ;;  %v881_v22 = vld [vmem:[#allocation6 + $0x30] sm:$0xff]   ;;  %v882_v23 = vld [vmem:[#allocation6 + $0x28] sm:$0xff]  }
  0x4a   : > { %v883_v24 = vld [vmem:[#allocation6 + $0x20] sm:$0xff]   ;;  %v884_v25 = vld [vmem:[#allocation6 + $0x18] sm:$0xff]   ;;  %v885_v26 = vld [vmem:[#allocation6 + $0x10] sm:$0xff]   ;;  %s1268_s15 = smov (!%p233_p4, %s1018_s15), 1 }
  0x4b   : > { %v271_v13 = vrot.slane %v269_v10, 1  ;;  %v276_v14 = vrot.slane %v274_v11, 1  ;;  %v886_v27 = vld [vmem:[#allocation6 + $0x8] sm:$0xff]   ;;  %v887_v28 = vld [vmem:[#allocation6] sm:$0xff]   ;;  %s724_s19 = sshll.u32 %s1268_s15, 7 }
  0x4c   : > { %747 = vmatpush3.bf16.msra.mxu1 %v873_v2  ;;  %771 = vmatpush3.bf16.msra.mxu0 %v881_v22  ;;  %s1196_s22 = scalar_lea.vmem %s1251_s3, %s724_s19 }
  0x4d   : > { %748 = vmatprep.subr.bf16.mxu1 %v1035_v0  ;;  %v272_v16 = vor.u32 %v271_v13, %v267_v9  ;;  %772 = vmatprep.subr.bf16.mxu0 %v1035_v0 }
  0x4f   : > { %v277_v18 = vsel %vm265_vm1, %v272_v16, %v276_v14 }
  0x50   : > { %749 = vmatpush3.bf16.msra.mxu1 %v874_v8  ;;  %773 = vmatpush3.bf16.msra.mxu0 %v882_v23 }
  0x51   : > { %750 = vmatprep.subr.bf16.mxu1 %v1035_v0  ;;  %774 = vmatprep.subr.bf16.mxu0 %v1035_v0 }
  0x54   : > { %751 = vmatpush3.bf16.msra.mxu1 %v875_v12  ;;  %775 = vmatpush3.bf16.msra.mxu0 %v883_v24 }
  0x55   : > { %756 = vmatprep.subr.bf16.mxu1 %v1035_v0  ;;  %776 = vmatprep.subr.bf16.mxu0 %v1035_v0 }
  0x57   : > { %753 = vmatmul.mubr.msk.bf16.vlgmr.msra.gmra.mxu1 %vm302_vm2, %v277_v18 }
  0x58   : > { %757 = vmatpush3.bf16.msra.mxu1 %v876_v17  ;;  %764 = vmatprep.mubr.msk.bf16.mxu1 %vm1036_vm0, %v1035_v0 }
  0x59   : > { %758 = vmatprep.subr.bf16.mxu1 %v1035_v0  ;;  %777 = vmatpush3.bf16.msra.mxu0 %v884_v25 }
  0x5a   : > { %778 = vmatprep.subr.bf16.mxu0 %v1035_v0 }
  0x5c   : > { %759 = vmatpush3.bf16.msra.mxu1 %v877_v19 }
  0x5d   : > { %760 = vmatprep.subr.bf16.mxu1 %v1035_v0  ;;  %779 = vmatpush3.bf16.msra.mxu0 %v885_v26 }
  0x5e   : > { %780 = vmatprep.subr.bf16.mxu0 %v1035_v0 }
  0x60   : > { %761 = vmatpush3.bf16.msra.mxu1 %v878_v20 }
  0x61   : > { %762 = vmatprep.subr.bf16.mxu1 %v1035_v0  ;;  %781 = vmatpush3.bf16.msra.mxu0 %v886_v27 }
  0x62   : > { %782 = vmatprep.subr.bf16.mxu0 %v1035_v0 }
  0x64   : > { %763 = vmatpush3.bf16.msra.mxu1 %v879_v21 }
  0x65   : > { %783 = vmatpush3.bf16.msra.mxu0 %v887_v28 }
  0x67   : > { %765 = vmatmul.mubr.msk.bf16.vlgmr.msra.gmra.mxu1 %vm302_vm2, %v247_v6 }
 0x117   : > { %v340_v29 = vpop.f32.mrf.mxu1 }
 0x119   : > { %v754_v30 = vpop.f32.mrf.mxu1 }
 0x11b   : > { %v343_v31 = vpop.f32.mrf.mxu1 }
 0x11d   : > { %v755_v32 = vpop.f32.mrf.mxu1 }
 0x127   : > { %v407_v33 = vpop.f32.mrf.mxu1 }
 0x128   : > { %v408_v35 = vadd.f32 %v407_v33, %v340_v29 }
 0x129   : > { %v766_v34 = vpop.f32.mrf.mxu1 }
 0x12a   : > { %v414_v39 = vmul.f32 %v408_v35, %v408_v35 }
 0x12b   : > { %v410_v36 = vpop.f32.mrf.mxu1 }
 0x12c   : > { %v411_v37 = vadd.f32 %v410_v36, %v343_v31 }
 0x12d   : > { %v767_v38 = vpop.f32.mrf.mxu1 }
 0x12e   : > { %v415_v40 = vmul.f32 %v411_v37, %v411_v37 }
 0x130   : > { %v416_v41 = vpack.c.bf16 %v415_v40, %v414_v39 }
 0x132   : > { %785 = vmatmul.mubr.bf16.vlgmr.msra.gmra.mxu0 %v416_v41 }
 0x1f2   : > { %v515_v42 = vpop.f32.mrf.mxu0 }
 0x1f3   : > { %v522_v43 = vmax.f32 %v515_v42, 1e-10 }
 0x1f4   : > { %v786_v44 = vpop.f32.mrf.mxu0 }
 0x1f5   : > { %888 = vlog2.f32 %v522_v43 }
 0x1f6   : > { %v518_v45 = vpop.f32.mrf.mxu0 }
 0x1f7   : > { %v523_v46 = vmax.f32 %v518_v45, 1e-10 }
 0x1f8   : > { %v787_v47 = vpop.f32.mrf.mxu0 }
 0x1f9   : > { %890 = vlog2.f32 %v523_v46 }
 0x202   : > { %v889_v48 = vpop.eup %888 }
 0x203   : > { %v525_v49 = vmul.f32 0.6931472, %v889_v48 }
 0x205   : > { %v528_v50 = vmul.f32 0.4342945, %v525_v49 }
 0x206   : > { %v891_v51 = vpop.eup %890 }
 0x207   : > { %v530_v52 = vmul.f32 10.0, %v528_v50  ;;  %v527_v53 = vmul.f32 0.6931472, %v891_v51 }
 0x209   : > { %532 = vxpose.xlu0.b32.start [1/2] (short) %v530_v52, 128  ;;  %v529_v54 = vmul.f32 0.4342945, %v527_v53 }
 0x20b   : > { %v531_v55 = vmul.f32 10.0, %v529_v54 }
 0x20d   : > { %533 = vxpose.xlu0.b32.end [2/2] (short) %v531_v55, 128 }
 0x285   : > { %v548_v56 = vpop.trf.xlu0 }
 0x286   : > { %565 = vst.msk [vmem:[%s1196_s22] sm:$0xff] %vm564_vm3, %v548_v56 }
 0x289   : > { %v549_v57 = vpop.trf.xlu0 }
 0x28a   : > { %566 = vst.msk [vmem:[%s1196_s22 + $0x8] sm:$0xff] %vm564_vm3, %v549_v57 }
 0x28d   : > { %v550_v58 = vpop.trf.xlu0 }
 0x28e   : > { %567 = vst.msk [vmem:[%s1196_s22 + $0x10] sm:$0xff] %vm564_vm3, %v550_v58 }
 0x291   : > { %v551_v59 = vpop.trf.xlu0 }
 0x292   : > { %568 = vst.msk [vmem:[%s1196_s22 + $0x18] sm:$0xff] %vm564_vm3, %v551_v59 }
 0x295   : > { %v552_v60 = vpop.trf.xlu0 }
 0x296   : > { %569 = vst.msk [vmem:[%s1196_s22 + $0x20] sm:$0xff] %vm564_vm3, %v552_v60 }
 0x299   : > { %v553_v61 = vpop.trf.xlu0 }
 0x29a   : > { %570 = vst.msk [vmem:[%s1196_s22 + $0x28] sm:$0xff] %vm564_vm3, %v553_v61 }
 0x29d   : > { %v554_v62 = vpop.trf.xlu0 }
 0x29e   : > { %571 = vst.msk [vmem:[%s1196_s22 + $0x30] sm:$0xff] %vm564_vm3, %v554_v62 }
 0x2a1   : > { %v555_v63 = vpop.trf.xlu0 }
 0x2a2   : > { %572 = vst.msk [vmem:[%s1196_s22 + $0x38] sm:$0xff] %vm564_vm3, %v555_v63 }
 0x2a5   : > { %v556_v0 = vpop.trf.xlu0 }
 0x2a6   : > { %573 = vst.msk [vmem:[%s1196_s22 + $0x40] sm:$0xff] %vm564_vm3, %v556_v0 }
 0x2a9   : > { %v557_v1 = vpop.trf.xlu0 }
 0x2aa   : > { %574 = vst.msk [vmem:[%s1196_s22 + $0x48] sm:$0xff] %vm564_vm3, %v557_v1 }
 0x2ad   : > { %v558_v2 = vpop.trf.xlu0 }
 0x2ae   : > { %575 = vst.msk [vmem:[%s1196_s22 + $0x50] sm:$0xff] %vm564_vm3, %v558_v2 }
 0x2b1   : > { %v559_v3 = vpop.trf.xlu0 }
 0x2b2   : > { %576 = vst.msk [vmem:[%s1196_s22 + $0x58] sm:$0xff] %vm564_vm3, %v559_v3 }
 0x2b5   : > { %v560_v4 = vpop.trf.xlu0 }
 0x2b6   : > { %577 = vst.msk [vmem:[%s1196_s22 + $0x60] sm:$0xff] %vm564_vm3, %v560_v4 }
 0x2b9   : > { %v561_v5 = vpop.trf.xlu0 }
 0x2ba   : > { %578 = vst.msk [vmem:[%s1196_s22 + $0x68] sm:$0xff] %vm564_vm3, %v561_v5 }
 0x2bd   : > { %v562_v6 = vpop.trf.xlu0 }
 0x2be   : > { %579 = vst.msk [vmem:[%s1196_s22 + $0x70] sm:$0xff] %vm564_vm3, %v562_v6 }
 0x2c1   : > { %v563_v7 = vpop.trf.xlu0 }
 0x2c2   : > { %580 = vst.msk [vmem:[%s1196_s22 + $0x78] sm:$0xff] %vm564_vm3, %v563_v7 }
 0x2c3 PF: > { %s17_s17 = sadd.s32 1, %s1026_s17   ;;  %s1260_s12 = smov %s1010_s13 }
 0x2c4   : > { %p14_p5 = scmp.ge.s32.totalorder %s17_s17, 4   ;;  %s1261_s13 = smov %s1014_s14 }
 0x2c5   : > { %s1262_s14 = smov %s1146_s23  ;;  %s1263_s15 = smov %s1022_s16 }
 0x2c6   : > { %s1264_s16 = smov %s1266_s8  ;;  %16 = sbr.rel (!%p14_p5) target bundleno = 5 (0x5), region = 81 }
 0x2cb   :  { %608 = vsyncpa [#allocation3], 1 }
 0x2cc   :  { %610 = vsyncpa [#allocation3 + $0x1], 1 }
 0x2cd   :  { %611 = vsyncpa [#allocation5], 1 }

</bundles_post_ra>
